<compile_context>
chip_gen: v6e
topology: v6e:2x2x1
jax: 0.10.0
libtpu: 0.0.40
codegen_flags: <defaults>
</compile_context>

<pallas_src>
import jax
import jax.numpy as jnp
from jax.experimental import pallas as pl
from jax.experimental.pallas import tpu as pltpu

B, D, C = 8, 32, 16          # batch, input features, num classes
DROP_P = 0.1                 # encoder input dropout probability
KL_ALPHA = 1.0

# Signed-int32 dropout threshold: a uniform random int32 lies in [-2^31, 2^31);
# drop iff r < T with P(r < T) = DROP_P  =>  T = DROP_P * 2^32 - 2^31  (exact 32-bit test).
_DROP_THRESH_I32 = int(DROP_P * (1 << 32)) - (1 << 31)


def rdrop_fused_kernel(x2_ref, w_ref, b_ref, bits_ref, labels_ref, out_ref):
    # ---------------- encoder: two stochastic passes, one batched matmul ----------------
    keep = bits_ref[...] >= jnp.int32(_DROP_THRESH_I32)        # integer-threshold dropout
    xd = jnp.where(keep, x2_ref[...] * (1.0 / (1.0 - DROP_P)), 0.0)      # (2B, D)
    logits = (
        jnp.dot(xd, w_ref[...], preferred_element_type=jnp.float32) + b_ref[...]
    )                                                                     # (2B, C)
    l1 = logits[:B, :]
    l2 = logits[B:, :]

    # ---------------- softmax statistics (exp reused for lse and probabilities) ---------
    m1 = jnp.max(l1, axis=-1, keepdims=True)
    m2 = jnp.max(l2, axis=-1, keepdims=True)
    e1 = jnp.exp(l1 - m1)
    e2 = jnp.exp(l2 - m2)
    s1 = jnp.sum(e1, axis=-1, keepdims=True)
    s2 = jnp.sum(e2, axis=-1, keepdims=True)
    lse1 = m1 + jnp.log(s1)
    lse2 = m2 + jnp.log(s2)

    # ---------------- CrossEntropyLoss (mean over batch); one-hot gather ---------------
    class_idx = jax.lax.broadcasted_iota(jnp.int32, (B, C), 1)
    onehot = class_idx == labels_ref[...]                       # labels (B, 1) int32
    picked1 = jnp.sum(jnp.where(onehot, l1, 0.0), axis=-1, keepdims=True)
    picked2 = jnp.sum(jnp.where(onehot, l2, 0.0), axis=-1, keepdims=True)
    ce_rows = (lse1 - picked1) + (lse2 - picked2)                # (B, 1)
    ce = jnp.sum(ce_rows, axis=0, keepdims=True) * (0.5 / B)     # (1, 1): (ce1+ce2)/2

    # ---------------- symmetric KL (KLDivLoss default 'mean' over B*C elements) --------
    logp1 = l1 - lse1
    logp2 = l2 - lse2
    q1 = e1 / s1
    q2 = e2 / s2
    # kl1 + kl2 = mean(q2*(logp2-logp1)) + mean(q1*(logp1-logp2))
    #           = mean((q2 - q1) * (logp2 - logp1))
    kl_rows = jnp.sum((q2 - q1) * (logp2 - logp1), axis=-1, keepdims=True)   # (B, 1)
    kl = jnp.sum(kl_rows, axis=0, keepdims=True) * (1.0 / (B * C))           # (1, 1)

    # NOTE: a (1,1) VMEM store is a masked single-lane vst; negligible at this size.
    out_ref[...] = ce + (KL_ALPHA * 0.5) * kl


def rdrop_forward(x, labels, w, b, dropout_key):
    # Per-call random bits for BOTH dropout passes (2B, D) -> the two encoder passes
    # are stochastic and independent, as in the PyTorch module.
    bits_u32 = jax.random.bits(dropout_key, (2 * B, D), dtype=jnp.uint32)
    bits_i32 = jax.lax.bitcast_convert_type(bits_u32, jnp.int32)
    x2 = jnp.concatenate([x, x], axis=0)                  # (2B, D): one batched MXU op
    labels2d = labels.astype(jnp.int32).reshape(B, 1)

    out = pl.pallas_call(
        rdrop_fused_kernel,
        out_shape=jax.ShapeDtypeStruct((1, 1), jnp.float32),
        in_specs=[
            pl.BlockSpec(memory_space=pltpu.MemorySpace.VMEM),   # x2     (2B, D) f32
            pl.BlockSpec(memory_space=pltpu.MemorySpace.VMEM),   # w      (D, C)  f32
            pl.BlockSpec(memory_space=pltpu.MemorySpace.VMEM),   # b      (1, C)  f32
            pl.BlockSpec(memory_space=pltpu.MemorySpace.VMEM),   # bits   (2B, D) i32
            pl.BlockSpec(memory_space=pltpu.MemorySpace.VMEM),   # labels (B, 1)  i32
        ],
        out_specs=pl.BlockSpec(memory_space=pltpu.MemorySpace.VMEM),
    )(x2, w, b, bits_i32, labels2d)
    return out[0, 0]


if __name__ == "__main__":
    key = jax.random.PRNGKey(0)
    kx, kw, kb, klab, kdrop = jax.random.split(key, 5)

    x = jax.random.normal(kx, (B, D), dtype=jnp.float32)
    labels = jax.random.randint(klab, (B,), 0, C, dtype=jnp.int32)

    # Deterministic synthetic encoder parameters (Linear(D, C))
    w = jax.random.normal(kw, (D, C), dtype=jnp.float32) * (1.0 / D ** 0.5)
    b = jax.random.normal(kb, (1, C), dtype=jnp.float32) * 0.01

    loss = rdrop_forward(x, labels, w, b, kdrop)
    jax.block_until_ready(loss)
    assert loss.shape == () and bool(jnp.isfinite(loss))
    print("KERNEL_OK")
</pallas_src>

<mosaic_0001>
module attributes {stable_mosaic.version = 11 : i64} {
  func.func @rdrop_fused_kernel(%arg0: memref<16x32xf32, #tpu.memory_space<vmem>>, %arg1: memref<32x16xf32, #tpu.memory_space<vmem>>, %arg2: memref<1x16xf32, #tpu.memory_space<vmem>>, %arg3: memref<16x32xi32, #tpu.memory_space<vmem>>, %arg4: memref<8x1xi32, #tpu.memory_space<vmem>>, %arg5: memref<1x1xf32, #tpu.memory_space<vmem>>) attributes {dimension_semantics = [], scalar_prefetch = 0 : i64, scratch_operands = 0 : i64, tpu.core_type = #tpu.core_type<tc>} {
    %c0 = arith.constant 0 : index
    %c0_0 = arith.constant 0 : index
    %0 = vector.load %arg3[%c0, %c0_0] : memref<16x32xi32, #tpu.memory_space<vmem>>, vector<16x32xi32>
    %c-1717986919_i32 = arith.constant -1717986919 : i32
    %1 = vector.broadcast %c-1717986919_i32 : i32 to vector<16x32xi32>
    %2 = arith.cmpi sge, %0, %1 : vector<16x32xi32>
    %c0_1 = arith.constant 0 : index
    %c0_2 = arith.constant 0 : index
    %3 = vector.load %arg0[%c0_1, %c0_2] : memref<16x32xf32, #tpu.memory_space<vmem>>, vector<16x32xf32>
    %cst = arith.constant 1.11111116 : f32
    %4 = vector.broadcast %cst : f32 to vector<16x32xf32>
    %5 = arith.mulf %3, %4 : vector<16x32xf32>
    %cst_3 = arith.constant 0.000000e+00 : f32
    %6 = vector.broadcast %cst_3 : f32 to vector<16x32xf32>
    %7 = arith.select %2, %5, %6 : vector<16x32xi1>, vector<16x32xf32>
    %c0_4 = arith.constant 0 : index
    %c0_5 = arith.constant 0 : index
    %8 = vector.load %arg1[%c0_4, %c0_5] : memref<32x16xf32, #tpu.memory_space<vmem>>, vector<32x16xf32>
    %cst_6 = arith.constant dense<0.000000e+00> : vector<16x16xf32>
    %9 = tpu.matmul %7, %8, %cst_6 {dimension_numbers = #tpu.dot_dimension_numbers<[1], [0], [0], [1], [0, 0, 1, 1], [], []>} : vector<16x32xf32>, vector<32x16xf32>, vector<16x16xf32> -> vector<16x16xf32>
    %c0_7 = arith.constant 0 : index
    %c0_8 = arith.constant 0 : index
    %10 = vector.load %arg2[%c0_7, %c0_8] : memref<1x16xf32, #tpu.memory_space<vmem>>, vector<1x16xf32>
    %11 = vector.broadcast %10 : vector<1x16xf32> to vector<16x16xf32>
    %12 = arith.addf %9, %11 : vector<16x16xf32>
    %13 = vector.extract_strided_slice %12 {offsets = [0, 0], sizes = [8, 16], strides = [1, 1]} : vector<16x16xf32> to vector<8x16xf32>
    %14 = vector.extract_strided_slice %12 {offsets = [8, 0], sizes = [8, 16], strides = [1, 1]} : vector<16x16xf32> to vector<8x16xf32>
    %cst_9 = arith.constant dense<0xFF800000> : vector<8xf32>
    %15 = vector.multi_reduction <maximumf>, %13, %cst_9 [1] : vector<8x16xf32> to vector<8xf32>
    %16 = vector.shape_cast %15 : vector<8xf32> to vector<8x1xf32>
    %cst_10 = arith.constant dense<0xFF800000> : vector<8xf32>
    %17 = vector.multi_reduction <maximumf>, %14, %cst_10 [1] : vector<8x16xf32> to vector<8xf32>
    %18 = vector.shape_cast %17 : vector<8xf32> to vector<8x1xf32>
    %19 = vector.broadcast %16 : vector<8x1xf32> to vector<8x16xf32>
    %20 = arith.subf %13, %19 : vector<8x16xf32>
    %21 = math.exp %20 : vector<8x16xf32>
    %22 = vector.broadcast %18 : vector<8x1xf32> to vector<8x16xf32>
    %23 = arith.subf %14, %22 : vector<8x16xf32>
    %24 = math.exp %23 : vector<8x16xf32>
    %cst_11 = arith.constant dense<0.000000e+00> : vector<8xf32>
    %25 = vector.multi_reduction <add>, %21, %cst_11 [1] : vector<8x16xf32> to vector<8xf32>
    %26 = vector.shape_cast %25 : vector<8xf32> to vector<8x1xf32>
    %cst_12 = arith.constant dense<0.000000e+00> : vector<8xf32>
    %27 = vector.multi_reduction <add>, %24, %cst_12 [1] : vector<8x16xf32> to vector<8xf32>
    %28 = vector.shape_cast %27 : vector<8xf32> to vector<8x1xf32>
    %29 = math.log %26 : vector<8x1xf32>
    %30 = arith.addf %16, %29 : vector<8x1xf32>
    %31 = math.log %28 : vector<8x1xf32>
    %32 = arith.addf %18, %31 : vector<8x1xf32>
    %33 = tpu.iota {dimensions = array<i32: 1>} : vector<8x16xi32>
    %c0_13 = arith.constant 0 : index
    %c0_14 = arith.constant 0 : index
    %34 = vector.load %arg4[%c0_13, %c0_14] : memref<8x1xi32, #tpu.memory_space<vmem>>, vector<8x1xi32>
    %35 = vector.broadcast %34 : vector<8x1xi32> to vector<8x16xi32>
    %36 = arith.cmpi eq, %33, %35 : vector<8x16xi32>
    %cst_15 = arith.constant 0.000000e+00 : f32
    %37 = vector.broadcast %cst_15 : f32 to vector<8x16xf32>
    %38 = arith.select %36, %13, %37 : vector<8x16xi1>, vector<8x16xf32>
    %cst_16 = arith.constant dense<0.000000e+00> : vector<8xf32>
    %39 = vector.multi_reduction <add>, %38, %cst_16 [1] : vector<8x16xf32> to vector<8xf32>
    %40 = vector.shape_cast %39 : vector<8xf32> to vector<8x1xf32>
    %cst_17 = arith.constant 0.000000e+00 : f32
    %41 = vector.broadcast %cst_17 : f32 to vector<8x16xf32>
    %42 = arith.select %36, %14, %41 : vector<8x16xi1>, vector<8x16xf32>
    %cst_18 = arith.constant dense<0.000000e+00> : vector<8xf32>
    %43 = vector.multi_reduction <add>, %42, %cst_18 [1] : vector<8x16xf32> to vector<8xf32>
    %44 = vector.shape_cast %43 : vector<8xf32> to vector<8x1xf32>
    %45 = arith.subf %30, %40 : vector<8x1xf32>
    %46 = arith.subf %32, %44 : vector<8x1xf32>
    %47 = arith.addf %45, %46 : vector<8x1xf32>
    %cst_19 = arith.constant dense<0.000000e+00> : vector<1xf32>
    %48 = vector.multi_reduction <add>, %47, %cst_19 [0] : vector<8x1xf32> to vector<1xf32>
    %49 = vector.shape_cast %48 : vector<1xf32> to vector<1x1xf32>
    %cst_20 = arith.constant 6.250000e-02 : f32
    %50 = vector.broadcast %cst_20 : f32 to vector<1x1xf32>
    %51 = arith.mulf %49, %50 : vector<1x1xf32>
    %52 = vector.broadcast %30 : vector<8x1xf32> to vector<8x16xf32>
    %53 = arith.subf %13, %52 : vector<8x16xf32>
    %54 = vector.broadcast %32 : vector<8x1xf32> to vector<8x16xf32>
    %55 = arith.subf %14, %54 : vector<8x16xf32>
    %56 = vector.broadcast %26 : vector<8x1xf32> to vector<8x16xf32>
    %57 = arith.divf %21, %56 : vector<8x16xf32>
    %58 = vector.broadcast %28 : vector<8x1xf32> to vector<8x16xf32>
    %59 = arith.divf %24, %58 : vector<8x16xf32>
    %60 = arith.subf %59, %57 : vector<8x16xf32>
    %61 = arith.subf %55, %53 : vector<8x16xf32>
    %62 = arith.mulf %60, %61 : vector<8x16xf32>
    %cst_21 = arith.constant dense<0.000000e+00> : vector<8xf32>
    %63 = vector.multi_reduction <add>, %62, %cst_21 [1] : vector<8x16xf32> to vector<8xf32>
    %64 = vector.shape_cast %63 : vector<8xf32> to vector<8x1xf32>
    %cst_22 = arith.constant dense<0.000000e+00> : vector<1xf32>
    %65 = vector.multi_reduction <add>, %64, %cst_22 [0] : vector<8x1xf32> to vector<1xf32>
    %66 = vector.shape_cast %65 : vector<1xf32> to vector<1x1xf32>
    %cst_23 = arith.constant 7.812500e-03 : f32
    %67 = vector.broadcast %cst_23 : f32 to vector<1x1xf32>
    %68 = arith.mulf %66, %67 : vector<1x1xf32>
    %cst_24 = arith.constant 5.000000e-01 : f32
    %69 = vector.broadcast %cst_24 : f32 to vector<1x1xf32>
    %70 = arith.mulf %69, %68 : vector<1x1xf32>
    %71 = arith.addf %51, %70 : vector<1x1xf32>
    %c0_25 = arith.constant 0 : index
    %c0_26 = arith.constant 0 : index
    %72 = vector.load %arg5[%c0_25, %c0_26] : memref<1x1xf32, #tpu.memory_space<vmem>>, vector<1x1xf32>
    tpu.vector_store %arg5[%c0_25, %c0_26], %71 {strides = array<i32>} : memref<1x1xf32, #tpu.memory_space<vmem>>, vector<1x1xf32>,
    return
  }
}

</mosaic_0001>

<bundles_post_ra>
// kernel: tpu_custom_call.1
= control target key start
LH: loop header
LB: loop body
LE: loop exit
PB: predicated region body
PF: predicated region fallthrough
CT: control target
= control target key end

     0   :  { %vm42_vm0 = vcmask 261120   ;;  %s342_s0 = inlined_call_operand.vmem [shape: f32[16,32], index: 0, kind: input, shape index: {}]   ;;  %s343_s1 = inlined_call_operand.vmem [shape: f32[32,16], index: 1, kind: input, shape index: {}]   ;;  %s344_s2 = inlined_call_operand.vmem [shape: f32[1,16], index: 2, kind: input, shape index: {}]   ;;  %s345_s3 = inlined_call_operand.vmem [shape: s32[16,32], index: 3, kind: input, shape index: {}]   ;;  %s346_s4 = inlined_call_operand.vmem [shape: s32[8,1], index: 4, kind: input, shape index: {}]   ;;  %s347_s5 = inlined_call_operand.hbm [shape: f32[1,1], index: 5, kind: output, shape index: {}]  }
   0x1   :  { %v34_v0 = vld [vmem:[%s343_s1 + $0x18] sm:$0xff]  ;;  %v33_v1 = vld [vmem:[%s343_s1 + $0x10] sm:$0xff]  ;;  %v32_v2 = vld [vmem:[%s343_s1 + $0x8] sm:$0xff] }
   0x2   :  { %220 = vmatprep.subr.mxu0 %v34_v0  ;;  %v21_v3 = vld [vmem:[%s345_s3] sm:$0xff]  ;;  %v22_v6 = vld [vmem:[%s345_s3 + $0x8] sm:$0xff] }
   0x3   :  { %v25_v4 = vld [vmem:[%s342_s0] sm:$0xff]  ;;  %221 = vmatpush3.msra.mxu0 %v34_v0  ;;  %vm23_vm1 = vcmp.ge.s32.totalorder %v21_v3, 2576980377  ;;  %v26_v7 = vld [vmem:[%s342_s0 + $0x8] sm:$0xff]  ;;  %vm24_vm2 = vcmp.ge.s32.totalorder %v22_v6, 2576980377 }
   0x4   :  { %v27_v5 = vmul.f32 1.1111112, %v25_v4  ;;  %222 = vmatprep.subr.mxu0 %v33_v1  ;;  %v28_v8 = vmul.f32 1.1111112, %v26_v7 }
   0x5   :  { %10 = vsyncpa [#allocation3], 0  ;;  %223 = vmatpush3.msra.mxu0 %v33_v1  ;;  %v31_v9 = vld [vmem:[%s343_s1] sm:$0xff]  ;;  %v268_v12 = vmov 0   ;;  %vm124_vm3 = vcmask 130048   ;;  %v149_v27 = vlaneseq  ;;  %vm195_vm5 = vcmask 0  }
   0x6   :  { %v29_v10 = vsel %vm23_vm1, %v27_v5, 0.0  ;;  %224 = vmatprep.subr.mxu0 %v32_v2  ;;  %v30_v11 = vsel %vm24_vm2, %v28_v8, 0.0  ;;  %233 = vset.pattern.permute.xlu0 %v268_v12  ;;  %v211_v14 = vld [vmem:[%s344_s2] ss:$0 sm:$0xff]  ;;  %s269_s2 = smov [#allocation2]  }
   0x7   :  { %228 = vmatprep.mubr.msk.f32.mxu0 %vm42_vm0, %v29_v10  ;;  %225 = vmatpush3.msra.mxu0 %v32_v2  ;;  %v151_v20 = vld [vmem:[%s346_s4] sm:$0xff]  ;;  %v150_v28 = vand.u32 127, %v149_v27  ;;  %s203_s4 = sshll.u32 %s269_s2, 4  ;;  %s204_s4 = int_to_ptr.vmem [resolvable:$true] %s203_s4 }
   0x8   :  { %226 = vmatprep.subr.mxu0 %v31_v9  ;;  %s246_s10 = scalar_lea.vmem %s204_s4, 16  ;;  %s250_s11 = scalar_lea.vmem %s204_s4, 32 }
   0x9   :  { %227 = vmatpush3.msra.mxu0 %v31_v9  ;;  %p247_p0 = scmp.ne.s32.totalorder %s204_s4, %s246_s10  ;;  %p251_p1 = scmp.lt.s32.totalorder %s204_s4, %s204_s4 }
   0xa   :  { %229 = vmatmul.mubr.msk.f32.vlgmr.msra.gmra.mxu0 %vm42_vm0, %v30_v11  ;;  %p252_p2 = scmp.lt.s32.totalorder %s250_s11, %s246_s10 }
   0xc   :  { %p253_p3 = por %p252_p2, %p251_p1 }
   0xe   :  { %p254_p4 = pnand %p253_p3, %p247_p0 }
  0xca   :  { %v230_v13 = vpop.f32.mrf.mxu0 }
  0xcb   :  { %v121_v17 = vadd.f32 %v230_v13, %v211_v14 }
  0xcc   :  { %v115_v15 = vpop.f32.mrf.mxu0 }
  0xcd   :  { %v116_v16 = vadd.f32 %v211_v14, %v115_v15  ;;  %v128_v19 = vsel %vm124_vm3, %v121_v17, -inf }
  0xcf   :  { %v125_v18 = vsel %vm124_vm3, %v116_v16, -inf }
  0xd0   :  { %126 = vmax.xlane.f32.xlu0 %v125_v18 }
  0xd4   :  { %129 = vmax.xlane.f32.xlu0 %v128_v19 }
  0xea   :  { %153 = vperm.xlu0 %233, %v151_v20  }
 0x159   :  { %v127_v21 = vpop.xlane.xlu0 %126 }
 0x15a   :  { %v131_v22 = vsub.f32 %v116_v16, %v127_v21 }
 0x15c   :  { %v132_v23 = vmul.f32 1.442695, %v131_v22 }
 0x15d   :  { %v130_v24 = vpop.xlane.xlu0 %129 }
 0x15e   :  { %234 = vpow2.f32 %v132_v23  ;;  %v134_v25 = vsub.f32 %v121_v17, %v130_v24 }
 0x160   :  { %v135_v26 = vmul.f32 1.442695, %v134_v25 }
 0x162   :  { %236 = vpow2.f32 %v135_v26 }
 0x165   :  { %v154_v30 = vpop.permute.xlu0 %153 }
 0x166   :  { %vm155_vm4 = vcmp.eq.s32.totalorder %v150_v28, %v154_v30 }
 0x167   :  { %v156_v34 = vsel %vm155_vm4, %v116_v16, 0.0  ;;  %v160_v36 = vsel %vm155_vm4, %v121_v17, 0.0 }
 0x168   :  { %v157_v35 = vsel %vm124_vm3, %v156_v34, 0.0  ;;  %v161_v37 = vsel %vm124_vm3, %v160_v36, 0.0 }
 0x16b   :  { %v235_v29 = vpop.eup %234 }
 0x16c   :  { %v137_v31 = vsel %vm124_vm3, %v235_v29, 0.0 }
 0x16d   :  { %138 = vadd.xlane.f32.xlu1 %v137_v31 }
 0x16f   :  { %v237_v32 = vpop.eup %236 }
 0x170   :  { %v140_v33 = vsel %vm124_vm3, %v237_v32, 0.0 }
 0x171   :  { %141 = vadd.xlane.f32.xlu1 %v140_v33 }
 0x175   :  { %158 = vadd.xlane.f32.xlu1 %v157_v35 }
 0x179   :  { %162 = vadd.xlane.f32.xlu1 %v161_v37 }
 0x1f6   :  { %v139_v38 = vpop.xlane.xlu1 %138 }
 0x1f7   :  { %238 = vlog2.f32 %v139_v38 }
 0x1f8   :  { %240 = vrcp.f32 %v139_v38 }
 0x1fa   :  { %v142_v39 = vpop.xlane.xlu1 %141 }
 0x1fb   :  { %242 = vlog2.f32 %v142_v39 }
 0x1fc   :  { %244 = vrcp.f32 %v142_v39 }
 0x1fe   :  { %v159_v42 = vpop.xlane.xlu1 %158 }
 0x202   :  { %v163_v50 = vpop.xlane.xlu1 %162 }
 0x204   :  { %v239_v40 = vpop.eup %238 }
 0x205   :  { %v144_v41 = vmul.f32 0.6931472, %v239_v40  ;;  %v241_v43 = vpop.eup %240 }
 0x206   :  { %v177_v51 = vmul.f32 %v241_v43, %v235_v29 }
 0x207   :  { %v145_v46 = vadd.f32 %v144_v41, %v127_v21 }
 0x208   :  { %v243_v44 = vpop.eup %242 }
 0x209   :  { %v245_v45 = vpop.eup %244  ;;  %v147_v47 = vmul.f32 0.6931472, %v243_v44  ;;  %v174_v52 = vsub.f32 %v116_v16, %v145_v46  ;;  %v164_v53 = vsub.f32 %v145_v46, %v159_v42 }
 0x20a   :  { %v179_v49 = vmul.f32 %v245_v45, %v237_v32 }
 0x20b   :  { %v148_v48 = vadd.f32 %v147_v47, %v130_v24 }
 0x20c   :  { %v180_v57 = vsub.f32 %v179_v49, %v177_v51 }
 0x20d   :  { %v175_v54 = vsub.f32 %v121_v17, %v148_v48  ;;  %v165_v55 = vsub.f32 %v148_v48, %v163_v50 }
 0x20f   :  { %v166_v56 = vadd.f32 %v165_v55, %v164_v53  ;;  %v181_v58 = vsub.f32 %v175_v54, %v174_v52 }
 0x211   :  { %v182_v59 = vmul.f32 %v181_v58, %v180_v57  ;;  %v167_v61 = vrot.slane %v166_v56, 4 }
 0x213   :  { %v183_v60 = vsel %vm124_vm3, %v182_v59, 0.0  ;;  %v168_v62 = vadd.f32 %v167_v61, %v166_v56 }
 0x214   :  { %184 = vadd.xlane.f32.xlu1 %v183_v60 }
 0x215   :  { %v169_v63 = vrot.slane %v168_v62, 2 }
 0x217   :  { %v170_v2 = vadd.f32 %v169_v63, %v168_v62 }
 0x219   :  { %v171_v6 = vrot.slane %v170_v2, 1 }
 0x21b   :  { %v172_v9 = vadd.f32 %v171_v6, %v170_v2 }
 0x21d   :  { %v173_v12 = vmul.f32 0.0625, %v172_v9 }
 0x29d   :  { %v185_v0 = vpop.xlane.xlu1 %184 }
 0x29e   :  { %v186_v1 = vrot.slane %v185_v0, 4 }
 0x2a0   :  { %v187_v3 = vadd.f32 %v186_v1, %v185_v0 }
 0x2a2   :  { %v188_v4 = vrot.slane %v187_v3, 2 }
 0x2a4   :  { %v189_v5 = vadd.f32 %v188_v4, %v187_v3 }
 0x2a6   :  { %v190_v7 = vrot.slane %v189_v5, 1 }
 0x2a8   :  { %v191_v8 = vadd.f32 %v190_v7, %v189_v5 }
 0x2aa   :  { %v192_v10 = vmul.f32 0.0078125, %v191_v8 }
 0x2ac   :  { %v193_v11 = vmul.f32 0.5, %v192_v10 }
 0x2ae   :  { %v194_v13 = vadd.f32 %v193_v11, %v173_v12 }
 0x2b0   :  { %196 = vst.msk [vmem:[#allocation2] sm:$0x1] %vm195_vm5, %v194_v13 }
 0x2b1   :  { %257 = shalt.err (!%p254_p4)
}
 0x2b2   :  { %206 = dma.vmem_to_hbm [thread:$0]  %s204_s4, 16, %s347_s5, [#allocation3]  }
 0x2b3   :  { %266 = dma.done.wait [#allocation3], 16  }
 0x2b4   :  { %267 = vsyncadd [#allocation3], 4294967280 }
 0x2b5   :  { %210 = vsyncpa [#allocation3], 1 }

</bundles_post_ra>
